<compile_context>
chip_gen: v5e
topology: v5e:2x2
jax: 0.10.0
libtpu: 0.0.40
codegen_flags: <defaults>
</compile_context>

<pallas_src>
import functools

import jax
import jax.numpy as jnp
from jax.experimental import pallas as pl
from jax.experimental.pallas import tpu as pltpu


def _round_up(x, m):
    return ((x + m - 1) // m) * m


def _fused_conv1d_relu_kernel(x_ref, *refs, s_pad, t_tile, n_chunks_max, k_pads):
    """x_ref: (s_pad, t_tile + n_chunks_max - 1) polyphase tile (time on lanes).

    refs = (w_0, b_0, w_1, b_1, ..., o_0, o_1, ..., slab_scratch)
      w_i : (C_i, k_pads[i])  phase/zero-padded conv weight
      b_i : (C_i, 1)
      o_i : (C_i, t_tile)     output tile, PyTorch NCL orientation (lane-dense)
      slab: (n_chunks_max * s_pad, t_tile) VMEM im2col scratch
    """
    n = len(k_pads)
    slab_ref = refs[-1]
    wb_refs = refs[: 2 * n]
    out_refs = refs[2 * n: 3 * n]

    # Build the im2col slab: row-block j holds the polyphase rows shifted by j
    # output frames.  Stores are sublane-aligned (s_pad % 8 == 0); the small
    # static lane-offset loads (offset j < n_chunks_max) go through the XLU.
    for j in range(n_chunks_max):
        slab_ref[pl.ds(j * s_pad, s_pad), :] = x_ref[:, pl.ds(j, t_tile)]

    # One MXU matmul per encoder: (C, K_pad) @ (K_pad, t_tile) -> (C, t_tile).
    for i in range(n):
        w_ref = wb_refs[2 * i]
        b_ref = wb_refs[2 * i + 1]
        acc = jnp.dot(w_ref[...], slab_ref[pl.ds(0, k_pads[i]), :],
                      preferred_element_type=jnp.float32)
        out_refs[i][...] = jnp.maximum(acc + b_ref[...], 0.0).astype(out_refs[i].dtype)


def multi_conv1d_relu_pallas(xw, convs, *, stride, t_tile_target=512):
    """Fused valid strided Conv1d(in_channels=1) + ReLU for several kernels.

    xw    : (B, T) waveform.
    convs : list of (w, b, t_out) with w: (C, K), b: (C,), t_out = number of
            output frames (zero right-padding is applied internally, matching
            F.pad(..., 'constant', 0)).  All t_out must be equal.
    Returns a tuple of (B, C, t_out) arrays (PyTorch NCL layout).
    """
    B, T = xw.shape
    S = stride
    t_out = convs[0][2]
    assert all(c[2] == t_out for c in convs), "fused convs must share t_out"

    s_pad = _round_up(S, 8)                              # phases -> sublane tile
    n_chunks = [-(-w.shape[1] // S) for (w, _, _) in convs]
    n_chunks_max = max(n_chunks)
    k_pads = [nc * s_pad for nc in n_chunks]
    k_pad_max = n_chunks_max * s_pad

    # Time tiling: big 128-aligned tiles when t_out is large, otherwise a single
    # full-extent tile (block == array dim -> no partial blocks at small sizes).
    t_tile_target = max(128, (t_tile_target // 128) * 128)
    t_tile = t_tile_target if t_out >= t_tile_target else t_out
    num_tiles = pl.cdiv(t_out, t_tile)
    t_blk = t_tile + n_chunks_max - 1                    # halo for shifted chunks

    # ---- wrapper-side layout (tiny vs. the output; done once by XLA) ----
    rows_needed = (num_tiles - 1) * t_tile + t_blk
    rows_total = max(rows_needed, -(-T // S))
    x_pad = jnp.pad(xw, ((0, 0), (0, rows_total * S - T)))          # zeros == F.pad
    x_phase = x_pad.reshape(B, rows_total, S).transpose(0, 2, 1)    # (B, S, rows)
    x_phase = jnp.pad(x_phase, ((0, 0), (0, s_pad - S), (0, 0)))    # (B, s_pad, rows)
    row_idx = (jnp.arange(num_tiles)[:, None] * t_tile
               + jnp.arange(t_blk)[None, :])                        # (tiles, t_blk)
    x_tiles = jnp.transpose(jnp.take(x_phase, row_idx, axis=2),
                            (0, 2, 1, 3))                           # (B, tiles, s_pad, t_blk)

    inputs = [x_tiles]
    in_specs = [pl.BlockSpec((None, None, s_pad, t_blk), lambda b, i: (b, i, 0, 0))]
    out_shapes = []
    out_specs = []
    for (w, bias, _), nc, kp in zip(convs, n_chunks, k_pads):
        C, K = w.shape
        # torch weight (C, K) -> chunks of S taps -> pad each chunk to s_pad taps.
        w_c = jnp.pad(w, ((0, 0), (0, nc * S - K))).reshape(C, nc, S)
        w_p = jnp.pad(w_c, ((0, 0), (0, 0), (0, s_pad - S))).reshape(C, kp)
        inputs += [w_p, bias.reshape(C, 1)]
        in_specs += [pl.BlockSpec((C, kp), lambda b, i: (0, 0)),
                     pl.BlockSpec((C, 1), lambda b, i: (0, 0))]
        out_shapes.append(jax.ShapeDtypeStruct((B, C, t_out), xw.dtype))
        out_specs.append(pl.BlockSpec((None, C, t_tile), lambda b, i: (b, 0, i)))

    kernel = functools.partial(
        _fused_conv1d_relu_kernel,
        s_pad=s_pad, t_tile=t_tile, n_chunks_max=n_chunks_max, k_pads=tuple(k_pads))

    outs = pl.pallas_call(
        kernel,
        out_shape=tuple(out_shapes),
        grid=(B, num_tiles),
        in_specs=in_specs,
        out_specs=tuple(out_specs),
        scratch_shapes=[pltpu.VMEM((k_pad_max, t_tile), jnp.float32)],
        compiler_params=pltpu.CompilerParams(
            dimension_semantics=("parallel", "parallel")),
    )(*inputs)
    return tuple(outs)


def init_params(key, embed_dim, L, L2, L3):
    """Deterministic xavier-uniform weights (bias = 0); weight stored as (C, K)."""
    ks = jax.random.split(key, 3)

    def xavier(k, C, K):
        fan_in, fan_out = 1 * K, C * K
        bound = (6.0 / (fan_in + fan_out)) ** 0.5
        return jax.random.uniform(k, (C, K), jnp.float32, -bound, bound)

    return {
        "w_short": xavier(ks[0], embed_dim, L),
        "b_short": jnp.zeros((embed_dim,), jnp.float32),
        "w_middle": xavier(ks[1], embed_dim, L2),
        "b_middle": jnp.zeros((embed_dim,), jnp.float32),
        "w_long": xavier(ks[2], embed_dim, L3),
        "b_long": jnp.zeros((embed_dim,), jnp.float32),
    }


def speech_encoder_forward(x, params, *, L, L1, L2, L3, t_tile=512):
    """x: (B, 1, T) NCL.  Returns (relu(x1), relu(x2), relu(x3)), each (B, C, T_out)."""
    B, _, T = x.shape
    xw = x[:, 0, :]
    S = L // 2                                   # PyTorch: stride = L // 2 for all convs
    T1 = (T - L) // S + 1
    len_middle = (T1 - 1) * (L1 // 2) + L2       # PyTorch computes pad lengths with L1 // 2
    len_long = (T1 - 1) * (L1 // 2) + L3
    T2 = (len_middle - L2) // S + 1
    T3 = (len_long - L3) // S + 1

    convs = [(params["w_short"], params["b_short"], T1),
             (params["w_middle"], params["b_middle"], T2),
             (params["w_long"], params["b_long"], T3)]

    if T1 == T2 == T3:                           # always true when L1 == L (SpEx default)
        return multi_conv1d_relu_pallas(xw, convs, stride=S, t_tile_target=t_tile)
    # General fallback (L1 != L): same lane-dense kernel, one call per encoder.
    return tuple(multi_conv1d_relu_pallas(xw, [c], stride=S, t_tile_target=t_tile)[0]
                 for c in convs)


# ---- pure-JAX reference for correctness checking ----
def _ref_conv1d_relu(xw, w, b, kernel_size, stride):
    B, T = xw.shape
    C, K = w.shape
    T_out = (T - kernel_size) // stride + 1
    idx = jnp.arange(T_out)[:, None] * stride + jnp.arange(K)[None, :]
    frames = xw[:, idx]                                  # (B, T_out, K)
    y = jnp.einsum("btk,ck->bct", frames, w) + b[None, :, None]
    return jax.nn.relu(y)                                # (B, C, T_out)


def _ref_forward(x, params, *, L, L1, L2, L3):
    B, _, T = x.shape
    xw = x[:, 0, :]
    S = L // 2
    x1 = _ref_conv1d_relu(xw, params["w_short"], params["b_short"], L, S)
    T1 = x1.shape[-1]
    len_middle = (T1 - 1) * (L1 // 2) + L2
    len_long = (T1 - 1) * (L1 // 2) + L3
    x2 = _ref_conv1d_relu(jnp.pad(xw, ((0, 0), (0, len_middle - T))),
                          params["w_middle"], params["b_middle"], L2, S)
    x3 = _ref_conv1d_relu(jnp.pad(xw, ((0, 0), (0, len_long - T))),
                          params["w_long"], params["b_long"], L3, S)
    return x1, x2, x3


if __name__ == "__main__":
    embed_dim, L, L1, L2, L3 = 32, 8, 8, 16, 24
    key = jax.random.PRNGKey(0)
    pkey, xkey1, xkey2 = jax.random.split(key, 3)
    params = init_params(pkey, embed_dim, L, L2, L3)

    # Config 1: tiny input -> single full-extent time tile.
    x_small = jax.random.normal(xkey1, (2, 1, 64), jnp.float32)
    outs = jax.block_until_ready(
        speech_encoder_forward(x_small, params, L=L, L1=L1, L2=L2, L3=L3))
    refs = _ref_forward(x_small, params, L=L, L1=L1, L2=L2, L3=L3)
    for o, r in zip(outs, refs):
        assert o.shape == r.shape, (o.shape, r.shape)
        assert jnp.allclose(o, r, atol=1e-5, rtol=1e-5), float(jnp.max(jnp.abs(o - r)))

    # Config 2: longer input exercising the (batch, time-tile) grid (2 full 128-tiles).
    x_big = jax.random.normal(xkey2, (2, 1, 1028), jnp.float32)
    outs = jax.block_until_ready(
        speech_encoder_forward(x_big, params, L=L, L1=L1, L2=L2, L3=L3, t_tile=128))
    refs = _ref_forward(x_big, params, L=L, L1=L1, L2=L2, L3=L3)
    for o, r in zip(outs, refs):
        assert o.shape == r.shape, (o.shape, r.shape)
        assert jnp.allclose(o, r, atol=1e-5, rtol=1e-5), float(jnp.max(jnp.abs(o - r)))

    print("KERNEL_OK")
</pallas_src>

<mosaic_0001>
module attributes {stable_mosaic.version = 11 : i64} {
  func.func @_fused_conv1d_relu_kernel(%arg0: i32, %arg1: i32, %arg2: memref<1x1x8x20xf32, #tpu.memory_space<vmem>>, %arg3: memref<32x16xf32, #tpu.memory_space<vmem>>, %arg4: memref<32x1xf32, #tpu.memory_space<vmem>>, %arg5: memref<32x32xf32, #tpu.memory_space<vmem>>, %arg6: memref<32x1xf32, #tpu.memory_space<vmem>>, %arg7: memref<32x48xf32, #tpu.memory_space<vmem>>, %arg8: memref<32x1xf32, #tpu.memory_space<vmem>>, %arg9: memref<1x32x15xf32, #tpu.memory_space<vmem>>, %arg10: memref<1x32x15xf32, #tpu.memory_space<vmem>>, %arg11: memref<1x32x15xf32, #tpu.memory_space<vmem>>, %arg12: memref<48x15xf32, #tpu.memory_space<vmem>>) attributes {dimension_semantics = [#tpu.dimension_semantics<parallel>, #tpu.dimension_semantics<parallel>], iteration_bounds = array<i64: 2, 1>, scalar_prefetch = 0 : i64, scratch_operands = 1 : i64, tpu.core_type = #tpu.core_type<tc>, window_params = [{transform_indices = @transform_0, window_bounds = array<i64: 1, 1, 8, 20>}, {pipeline_mode = #tpu.pipeline_mode<synchronous>, transform_indices = @transform_1, window_bounds = array<i64: 32, 16>}, {pipeline_mode = #tpu.pipeline_mode<synchronous>, transform_indices = @transform_2, window_bounds = array<i64: 32, 1>}, {pipeline_mode = #tpu.pipeline_mode<synchronous>, transform_indices = @transform_3, window_bounds = array<i64: 32, 32>}, {pipeline_mode = #tpu.pipeline_mode<synchronous>, transform_indices = @transform_4, window_bounds = array<i64: 32, 1>}, {pipeline_mode = #tpu.pipeline_mode<synchronous>, transform_indices = @transform_5, window_bounds = array<i64: 32, 48>}, {pipeline_mode = #tpu.pipeline_mode<synchronous>, transform_indices = @transform_6, window_bounds = array<i64: 32, 1>}, {transform_indices = @transform_7, window_bounds = array<i64: 1, 32, 15>}, {transform_indices = @transform_8, window_bounds = array<i64: 1, 32, 15>}, {transform_indices = @transform_9, window_bounds = array<i64: 1, 32, 15>}]} {
    %c0 = arith.constant 0 : index
    %c0_0 = arith.constant 0 : index
    %c0_1 = arith.constant 0 : index
    %c0_2 = arith.constant 0 : index
    %0 = vector.load %arg2[%c0, %c0_0, %c0_1, %c0_2] : memref<1x1x8x20xf32, #tpu.memory_space<vmem>>, vector<1x1x8x15xf32>
    %1 = vector.shape_cast %0 : vector<1x1x8x15xf32> to vector<8x15xf32>
    %c0_3 = arith.constant 0 : index
    %c0_4 = arith.constant 0 : index
    %2 = vector.load %arg12[%c0_3, %c0_4] : memref<48x15xf32, #tpu.memory_space<vmem>>, vector<8x15xf32>
    tpu.vector_store %arg12[%c0_3, %c0_4], %1 {strides = array<i32>} : memref<48x15xf32, #tpu.memory_space<vmem>>, vector<8x15xf32>,
    %c0_5 = arith.constant 0 : index
    %c0_6 = arith.constant 0 : index
    %c0_7 = arith.constant 0 : index
    %c1 = arith.constant 1 : index
    %3 = vector.load %arg2[%c0_5, %c0_6, %c0_7, %c1] : memref<1x1x8x20xf32, #tpu.memory_space<vmem>>, vector<1x1x8x15xf32>
    %4 = vector.shape_cast %3 : vector<1x1x8x15xf32> to vector<8x15xf32>
    %c8 = arith.constant 8 : index
    %c0_8 = arith.constant 0 : index
    %5 = vector.load %arg12[%c8, %c0_8] : memref<48x15xf32, #tpu.memory_space<vmem>>, vector<8x15xf32>
    tpu.vector_store %arg12[%c8, %c0_8], %4 {strides = array<i32>} : memref<48x15xf32, #tpu.memory_space<vmem>>, vector<8x15xf32>,
    %c0_9 = arith.constant 0 : index
    %c0_10 = arith.constant 0 : index
    %c0_11 = arith.constant 0 : index
    %c2 = arith.constant 2 : index
    %6 = vector.load %arg2[%c0_9, %c0_10, %c0_11, %c2] : memref<1x1x8x20xf32, #tpu.memory_space<vmem>>, vector<1x1x8x15xf32>
    %7 = vector.shape_cast %6 : vector<1x1x8x15xf32> to vector<8x15xf32>
    %c16 = arith.constant 16 : index
    %c0_12 = arith.constant 0 : index
    %8 = vector.load %arg12[%c16, %c0_12] : memref<48x15xf32, #tpu.memory_space<vmem>>, vector<8x15xf32>
    tpu.vector_store %arg12[%c16, %c0_12], %7 {strides = array<i32>} : memref<48x15xf32, #tpu.memory_space<vmem>>, vector<8x15xf32>,
    %c0_13 = arith.constant 0 : index
    %c0_14 = arith.constant 0 : index
    %c0_15 = arith.constant 0 : index
    %c3 = arith.constant 3 : index
    %9 = vector.load %arg2[%c0_13, %c0_14, %c0_15, %c3] : memref<1x1x8x20xf32, #tpu.memory_space<vmem>>, vector<1x1x8x15xf32>
    %10 = vector.shape_cast %9 : vector<1x1x8x15xf32> to vector<8x15xf32>
    %c24 = arith.constant 24 : index
    %c0_16 = arith.constant 0 : index
    %11 = vector.load %arg12[%c24, %c0_16] : memref<48x15xf32, #tpu.memory_space<vmem>>, vector<8x15xf32>
    tpu.vector_store %arg12[%c24, %c0_16], %10 {strides = array<i32>} : memref<48x15xf32, #tpu.memory_space<vmem>>, vector<8x15xf32>,
    %c0_17 = arith.constant 0 : index
    %c0_18 = arith.constant 0 : index
    %c0_19 = arith.constant 0 : index
    %c4 = arith.constant 4 : index
    %12 = vector.load %arg2[%c0_17, %c0_18, %c0_19, %c4] : memref<1x1x8x20xf32, #tpu.memory_space<vmem>>, vector<1x1x8x15xf32>
    %13 = vector.shape_cast %12 : vector<1x1x8x15xf32> to vector<8x15xf32>
    %c32 = arith.constant 32 : index
    %c0_20 = arith.constant 0 : index
    %14 = vector.load %arg12[%c32, %c0_20] : memref<48x15xf32, #tpu.memory_space<vmem>>, vector<8x15xf32>
    tpu.vector_store %arg12[%c32, %c0_20], %13 {strides = array<i32>} : memref<48x15xf32, #tpu.memory_space<vmem>>, vector<8x15xf32>,
    %c0_21 = arith.constant 0 : index
    %c0_22 = arith.constant 0 : index
    %c0_23 = arith.constant 0 : index
    %c5 = arith.constant 5 : index
    %15 = vector.load %arg2[%c0_21, %c0_22, %c0_23, %c5] : memref<1x1x8x20xf32, #tpu.memory_space<vmem>>, vector<1x1x8x15xf32>
    %16 = vector.shape_cast %15 : vector<1x1x8x15xf32> to vector<8x15xf32>
    %c40 = arith.constant 40 : index
    %c0_24 = arith.constant 0 : index
    %17 = vector.load %arg12[%c40, %c0_24] : memref<48x15xf32, #tpu.memory_space<vmem>>, vector<8x15xf32>
    tpu.vector_store %arg12[%c40, %c0_24], %16 {strides = array<i32>} : memref<48x15xf32, #tpu.memory_space<vmem>>, vector<8x15xf32>,
    %c0_25 = arith.constant 0 : index
    %c0_26 = arith.constant 0 : index
    %18 = vector.load %arg3[%c0_25, %c0_26] : memref<32x16xf32, #tpu.memory_space<vmem>>, vector<32x16xf32>
    %c0_27 = arith.constant 0 : index
    %c0_28 = arith.constant 0 : index
    %19 = vector.load %arg12[%c0_27, %c0_28] : memref<48x15xf32, #tpu.memory_space<vmem>>, vector<16x15xf32>
    %cst = arith.constant dense<0.000000e+00> : vector<32x15xf32>
    %20 = tpu.matmul %18, %19, %cst {dimension_numbers = #tpu.dot_dimension_numbers<[1], [0], [0], [1], [0, 0, 1, 1], [], []>} : vector<32x16xf32>, vector<16x15xf32>, vector<32x15xf32> -> vector<32x15xf32>
    %c0_29 = arith.constant 0 : index
    %c0_30 = arith.constant 0 : index
    %21 = vector.load %arg4[%c0_29, %c0_30] : memref<32x1xf32, #tpu.memory_space<vmem>>, vector<32x1xf32>
    %22 = vector.broadcast %21 : vector<32x1xf32> to vector<32x15xf32>
    %23 = arith.addf %20, %22 : vector<32x15xf32>
    %cst_31 = arith.constant 0.000000e+00 : f32
    %24 = vector.broadcast %cst_31 : f32 to vector<32x15xf32>
    %25 = arith.maximumf %23, %24 : vector<32x15xf32>
    %c0_32 = arith.constant 0 : index
    %c0_33 = arith.constant 0 : index
    %c0_34 = arith.constant 0 : index
    %26 = vector.load %arg9[%c0_32, %c0_33, %c0_34] : memref<1x32x15xf32, #tpu.memory_space<vmem>>, vector<1x32x15xf32>
    %27 = vector.shape_cast %26 : vector<1x32x15xf32> to vector<32x15xf32>
    %28 = vector.shape_cast %25 : vector<32x15xf32> to vector<1x32x15xf32>
    tpu.vector_store %arg9[%c0_32, %c0_33, %c0_34], %28 {strides = array<i32>} : memref<1x32x15xf32, #tpu.memory_space<vmem>>, vector<1x32x15xf32>,
    %c0_35 = arith.constant 0 : index
    %c0_36 = arith.constant 0 : index
    %29 = vector.load %arg5[%c0_35, %c0_36] : memref<32x32xf32, #tpu.memory_space<vmem>>, vector<32x32xf32>
    %c0_37 = arith.constant 0 : index
    %c0_38 = arith.constant 0 : index
    %30 = vector.load %arg12[%c0_37, %c0_38] : memref<48x15xf32, #tpu.memory_space<vmem>>, vector<32x15xf32>
    %cst_39 = arith.constant dense<0.000000e+00> : vector<32x15xf32>
    %31 = tpu.matmul %29, %30, %cst_39 {dimension_numbers = #tpu.dot_dimension_numbers<[1], [0], [0], [1], [0, 0, 1, 1], [], []>} : vector<32x32xf32>, vector<32x15xf32>, vector<32x15xf32> -> vector<32x15xf32>
    %c0_40 = arith.constant 0 : index
    %c0_41 = arith.constant 0 : index
    %32 = vector.load %arg6[%c0_40, %c0_41] : memref<32x1xf32, #tpu.memory_space<vmem>>, vector<32x1xf32>
    %33 = vector.broadcast %32 : vector<32x1xf32> to vector<32x15xf32>
    %34 = arith.addf %31, %33 : vector<32x15xf32>
    %cst_42 = arith.constant 0.000000e+00 : f32
    %35 = vector.broadcast %cst_42 : f32 to vector<32x15xf32>
    %36 = arith.maximumf %34, %35 : vector<32x15xf32>
    %c0_43 = arith.constant 0 : index
    %c0_44 = arith.constant 0 : index
    %c0_45 = arith.constant 0 : index
    %37 = vector.load %arg10[%c0_43, %c0_44, %c0_45] : memref<1x32x15xf32, #tpu.memory_space<vmem>>, vector<1x32x15xf32>
    %38 = vector.shape_cast %37 : vector<1x32x15xf32> to vector<32x15xf32>
    %39 = vector.shape_cast %36 : vector<32x15xf32> to vector<1x32x15xf32>
    tpu.vector_store %arg10[%c0_43, %c0_44, %c0_45], %39 {strides = array<i32>} : memref<1x32x15xf32, #tpu.memory_space<vmem>>, vector<1x32x15xf32>,
    %c0_46 = arith.constant 0 : index
    %c0_47 = arith.constant 0 : index
    %40 = vector.load %arg7[%c0_46, %c0_47] : memref<32x48xf32, #tpu.memory_space<vmem>>, vector<32x48xf32>
    %c0_48 = arith.constant 0 : index
    %c0_49 = arith.constant 0 : index
    %41 = vector.load %arg12[%c0_48, %c0_49] : memref<48x15xf32, #tpu.memory_space<vmem>>, vector<48x15xf32>
    %cst_50 = arith.constant dense<0.000000e+00> : vector<32x15xf32>
    %42 = tpu.matmul %40, %41, %cst_50 {dimension_numbers = #tpu.dot_dimension_numbers<[1], [0], [0], [1], [0, 0, 1, 1], [], []>} : vector<32x48xf32>, vector<48x15xf32>, vector<32x15xf32> -> vector<32x15xf32>
    %c0_51 = arith.constant 0 : index
    %c0_52 = arith.constant 0 : index
    %43 = vector.load %arg8[%c0_51, %c0_52] : memref<32x1xf32, #tpu.memory_space<vmem>>, vector<32x1xf32>
    %44 = vector.broadcast %43 : vector<32x1xf32> to vector<32x15xf32>
    %45 = arith.addf %42, %44 : vector<32x15xf32>
    %cst_53 = arith.constant 0.000000e+00 : f32
    %46 = vector.broadcast %cst_53 : f32 to vector<32x15xf32>
    %47 = arith.maximumf %45, %46 : vector<32x15xf32>
    %c0_54 = arith.constant 0 : index
    %c0_55 = arith.constant 0 : index
    %c0_56 = arith.constant 0 : index
    %48 = vector.load %arg11[%c0_54, %c0_55, %c0_56] : memref<1x32x15xf32, #tpu.memory_space<vmem>>, vector<1x32x15xf32>
    %49 = vector.shape_cast %48 : vector<1x32x15xf32> to vector<32x15xf32>
    %50 = vector.shape_cast %47 : vector<32x15xf32> to vector<1x32x15xf32>
    tpu.vector_store %arg11[%c0_54, %c0_55, %c0_56], %50 {strides = array<i32>} : memref<1x32x15xf32, #tpu.memory_space<vmem>>, vector<1x32x15xf32>,
    return
  }
  func.func @transform_0(%arg0: i32, %arg1: i32) -> (i32, i32, i32, i32) {
    %c0_i32 = arith.constant 0 : i32
    %c0_i32_0 = arith.constant 0 : i32
    %c0_i32_1 = arith.constant 0 : i32
    return %arg0, %arg1, %c0_i32, %c0_i32_0 : i32, i32, i32, i32
  }
  func.func @transform_1(%arg0: i32, %arg1: i32) -> (i32, i32) {
    %c0_i32 = arith.constant 0 : i32
    %c0_i32_0 = arith.constant 0 : i32
    %c0_i32_1 = arith.constant 0 : i32
    return %c0_i32, %c0_i32_0 : i32, i32
  }
  func.func @transform_2(%arg0: i32, %arg1: i32) -> (i32, i32) {
    %c0_i32 = arith.constant 0 : i32
    %c0_i32_0 = arith.constant 0 : i32
    %c0_i32_1 = arith.constant 0 : i32
    return %c0_i32, %c0_i32_0 : i32, i32
  }
  func.func @transform_3(%arg0: i32, %arg1: i32) -> (i32, i32) {
    %c0_i32 = arith.constant 0 : i32
    %c0_i32_0 = arith.constant 0 : i32
    %c0_i32_1 = arith.constant 0 : i32
    return %c0_i32, %c0_i32_0 : i32, i32
  }
  func.func @transform_4(%arg0: i32, %arg1: i32) -> (i32, i32) {
    %c0_i32 = arith.constant 0 : i32
    %c0_i32_0 = arith.constant 0 : i32
    %c0_i32_1 = arith.constant 0 : i32
    return %c0_i32, %c0_i32_0 : i32, i32
  }
  func.func @transform_5(%arg0: i32, %arg1: i32) -> (i32, i32) {
    %c0_i32 = arith.constant 0 : i32
    %c0_i32_0 = arith.constant 0 : i32
    %c0_i32_1 = arith.constant 0 : i32
    return %c0_i32, %c0_i32_0 : i32, i32
  }
  func.func @transform_6(%arg0: i32, %arg1: i32) -> (i32, i32) {
    %c0_i32 = arith.constant 0 : i32
    %c0_i32_0 = arith.constant 0 : i32
    %c0_i32_1 = arith.constant 0 : i32
    return %c0_i32, %c0_i32_0 : i32, i32
  }
  func.func @transform_7(%arg0: i32, %arg1: i32) -> (i32, i32, i32) {
    %c0_i32 = arith.constant 0 : i32
    %c0_i32_0 = arith.constant 0 : i32
    return %arg0, %c0_i32, %arg1 : i32, i32, i32
  }
  func.func @transform_8(%arg0: i32, %arg1: i32) -> (i32, i32, i32) {
    %c0_i32 = arith.constant 0 : i32
    %c0_i32_0 = arith.constant 0 : i32
    return %arg0, %c0_i32, %arg1 : i32, i32, i32
  }
  func.func @transform_9(%arg0: i32, %arg1: i32) -> (i32, i32, i32) {
    %c0_i32 = arith.constant 0 : i32
    %c0_i32_0 = arith.constant 0 : i32
    return %arg0, %c0_i32, %arg1 : i32, i32, i32
  }
}

</mosaic_0001>

<bundles_post_ra>
// kernel: tpu_custom_call.1
= control target key start
LH: loop header
LB: loop body
LE: loop exit
PB: predicated region body
PF: predicated region fallthrough
CT: control target
= control target key end

     0   :  { %s1003_s30 = smov 0   ;;  %s1005_s10 = smov 0   ;;  %s1161_s0 = inlined_call_operand.vmem [shape: f32[2,1,8,20], index: 0, kind: input, shape index: {}]   ;;  %s1162_s1 = inlined_call_operand.vmem [shape: f32[32,16], index: 1, kind: input, shape index: {}]   ;;  %s1163_s2 = inlined_call_operand.vmem [shape: f32[32,1], index: 2, kind: input, shape index: {}]   ;;  %s1164_s3 = inlined_call_operand.vmem [shape: f32[32,32], index: 3, kind: input, shape index: {}]   ;;  %s1165_s4 = inlined_call_operand.vmem [shape: f32[32,1], index: 4, kind: input, shape index: {}]   ;;  %s1166_s5 = inlined_call_operand.vmem [shape: f32[32,48], index: 5, kind: input, shape index: {}]   ;;  %s1167_s6 = inlined_call_operand.vmem [shape: f32[32,1], index: 6, kind: input, shape index: {}]   ;;  %s1168_s7 = inlined_call_operand.vmem [shape: f32[2,32,15], index: 7, kind: output, shape index: {0}]   ;;  %s1169_s8 = inlined_call_operand.vmem [shape: f32[2,32,15], index: 8, kind: output, shape index: {1}]   ;;  %s1170_s9 = inlined_call_operand.vmem [shape: f32[2,32,15], index: 9, kind: output, shape index: {2}]  }
   0x1   :  { %s1007_s11 = smov 0  }
   0x2 LB: > { %s32_s12 = sadd.s32 1, %s941_s10  ;;  %p859_p0 = scmp.ge.s32.totalorder %s945_s11, 1  ;;  %s945_s11 = sphi %s1007_s11, %s20_s11   ;;  %s941_s10 = sphi %s1005_s10, %s1172_s10   ;;  %s937_s30 = sphi %s1003_s30, %s1171_s30  }
   0x3   : > { %p34_p1 = scmp.ge.s32.totalorder %s32_s12, 2  ;;  %p314_p2 = scmp.lt.s32.totalorder %s945_s11, 3 }
   0x5   : > { %s1174_s12 = smov (%p34_p1, %s32_s12), 0  ;;  %p315_p3 = pnand %p859_p0, %p314_p2 }
   0x6   : > { %p371_p4 = scmp.lt.s32.totalorder (!%p315_p3), %s937_s30, 1  ;;  %s947_s17 = smov (!%p315_p3), 123  }
   0x7   : > { %318 = sbr.rel (%p315_p3) target bundleno = 309 (0x135), region = 48  ;;  %s948_s18 = smov (!%p315_p3), 124  }
   0x8   : > { %s949_s19 = smov (!%p315_p3), 127   ;;  %s950_s20 = smov (!%p315_p3), 125  }
   0x9   : > { %s951_s21 = smov (!%p315_p3), 126  }
   0xc   : > { %s1176_s30 = smov (!%p371_p4, %s937_s30), 1  ;;  %vm403_vm0 = vcmask 121856   ;;  %v952_v2 = vmov 0   ;;  %v443_v3 = vld [vmem:[%s1163_s2 + $0x10] sm:$0xff]  ;;  %v435_v6 = vld [vmem:[%s1162_s1] sm:$0xff]  ;;  %vm465_vm1 = vcmask 130048  }
   0xd   : > { %s860_s13 = sshll.u32 %s1176_s30, 3  ;;  %922 = vset.pattern.permute.xlu1 %v952_v2  ;;  %920 = vset.pattern.permute.xlu2 %v952_v2  ;;  %v523_v7 = vld [vmem:[%s1165_s4] sm:$0xff]  ;;  %v442_v9 = vld [vmem:[%s1163_s2 + $0x8] sm:$0xff]  ;;  %v526_v10 = vld [vmem:[%s1165_s4 + $0x18] sm:$0xff]  ;;  %vm547_vm2 = vcmask 261120   ;;  %vm631_vm3 = vcmask 392192  }
   0xe   : > { %s377_s16 = scalar_lea.vmem %s1161_s0, %s860_s13  ;;  %921 = vset.pattern.permute.xlu0 %v952_v2  ;;  %v441_v8 = vld [vmem:[%s1163_s2] sm:$0xff]  ;;  %v444_v11 = vld [vmem:[%s1163_s2 + $0x18] sm:$0xff]  ;;  %v436_v12 = vld [vmem:[%s1162_s1 + $0x8] sm:$0xff] }
   0xf   : > { %v429_v0 = vld [vmem:[%s377_s16] sm:$0xff]  ;;  %v525_v15 = vld [vmem:[%s1165_s4 + $0x10] sm:$0xff]  ;;  %v524_v17 = vld [vmem:[%s1165_s4 + $0x8] sm:$0xff] }
  0x10   : > { %431 = vrot.lane.b32.xlu0 %v429_v0, %s947_s17  ;;  %404 = vst.msk [vmem:[#allocation2] sm:$0xff] %vm403_vm0, %v429_v0  ;;  %425 = vrot.lane.b32.xlu1 %v429_v0, %s948_s18  ;;  %v609_v16 = vld [vmem:[%s1167_s6 + $0x10] sm:$0xff]  ;;  %v608_v23 = vld [vmem:[%s1167_s6 + $0x8] sm:$0xff] }
  0x11   : > { %407 = vrot.lane.b32.xlu2 %v429_v0, %s949_s19  ;;  %v437_v18 = vld [vmem:[%s1162_s1 + $0x10] sm:$0xff]  ;;  %v607_v24 = vld [vmem:[%s1167_s6] sm:$0xff]  ;;  %v438_v25 = vld [vmem:[%s1162_s1 + $0x18] sm:$0xff]  ;;  %s1120_s19 = sshll.u32 %s1176_s30, 5 }
  0x12   : > { %v610_v28 = vld [vmem:[%s1167_s6 + $0x18] sm:$0xff]  ;;  %v515_v29 = vld [vmem:[%s1164_s3] sm:$0xff]  ;;  %v598_v31 = vld [vmem:[%s1166_s5 + $0x8] sm:$0xff]  ;;  %s385_s22 = scalar_lea.vmem %s1168_s7, %s1120_s19  ;;  %s1134_s24 = scalar_lea.vmem %s1169_s8, %s1120_s19 }
  0x13   : > { %v597_v30 = vld [vmem:[%s1166_s5] sm:$0xff]  ;;  %v516_v32 = vld [vmem:[%s1164_s3 + $0x8] sm:$0xff]  ;;  %v599_v33 = vld [vmem:[%s1166_s5 + $0x10] sm:$0xff]  ;;  %s401_s27 = scalar_lea.vmem %s1170_s9, %s1120_s19 }
  0x14   : > { %v517_v34 = vld [vmem:[%s1164_s3 + $0x10] sm:$0xff]  ;;  %v600_v35 = vld [vmem:[%s1166_s5 + $0x18] sm:$0xff] }
  0x15   : > { %v518_v36 = vld [vmem:[%s1164_s3 + $0x18] sm:$0xff] }
  0x17   : > { %v1032_v5 = vld [vmem:[#allocation2] sm:$0xff] }
  0x18   : > { %419 = vrot.lane.b32.xlu0 %v429_v0, %s950_s20  ;;  %413 = vrot.lane.b32.xlu1 %v429_v0, %s951_s21 }
  0x19   : > { %447 = vperm.xlu2 %920, %v441_v8  }
  0x20   : > { %457 = vperm.xlu1 %922, %v443_v3   ;;  %452 = vperm.xlu0 %921, %v442_v9  }
  0x21   : > { %462 = vperm.xlu2 %920, %v444_v11  }
  0x28   : > { %529 = vperm.xlu1 %922, %v523_v7   ;;  %539 = vperm.xlu0 %921, %v525_v15  }
  0x29   : > { %534 = vperm.xlu2 %920, %v524_v17  }
  0x30   : > { %544 = vperm.xlu1 %922, %v526_v10   ;;  %618 = vperm.xlu0 %921, %v608_v23  }
  0x31   : > { %613 = vperm.xlu2 %920, %v607_v24  }
  0x38   : > { %623 = vperm.xlu1 %922, %v609_v16  }
  0x39   : > { %628 = vperm.xlu2 %920, %v610_v28  }
  0x6b   : > { %v408_v1 = vpop.permute.xlu2 %407 }
  0x6c   : > { %410 = vst.msk [vmem:[#allocation2 + $0x8] sm:$0xff] %vm403_vm0, %v408_v1 }
  0x73   : > { %v440_v4 = vld [vmem:[#allocation2 + $0x8] sm:$0xff]  ;;  %v448_v37 = vpop.permute.xlu2 %447 }
  0x74   : > { %492 = vmatpush.msra.mxu0 %v440_v4 }
  0x76   : > { %493 = vmatpush.msra.mxu0 %v1032_v5 }
  0x77   : > { %867 = vmatmul.msk.f32.vlgmr.msra.gmra.mxu0 %vm465_vm1, %v435_v6 }
  0x7b   : > { %v463_v49 = vpop.permute.xlu2 %462 }
  0x7f   : > { %868 = vmatmul.msk.f32.gmra.mxu0 %vm465_vm1, %v436_v12 }
  0x82   : > { %v432_v13 = vpop.permute.xlu0 %431  ;;  %v426_v14 = vpop.permute.xlu1 %425 }
  0x83   : > { %434 = vst.msk [vmem:[#allocation2 + $0x28] sm:$0xff] %vm403_vm0, %v432_v13  ;;  %v535_v55 = vpop.permute.xlu2 %534 }
  0x84   : > { %428 = vst.msk [vmem:[#allocation2 + $0x20] sm:$0xff] %vm403_vm0, %v426_v14 }
  0x87   : > { %869 = vmatmul.msk.f32.gmra.mxu0 %vm465_vm1, %v437_v18 }
  0x8a   : > { %v420_v19 = vpop.permute.xlu0 %419  ;;  %v606_v20 = vld [vmem:[#allocation2 + $0x28] sm:$0xff]  ;;  %v414_v21 = vpop.permute.xlu1 %413 }
  0x8b   : > { %422 = vst.msk [vmem:[#allocation2 + $0x18] sm:$0xff] %vm403_vm0, %v420_v19  ;;  %654 = vmatpush.msra.mxu2 %v606_v20  ;;  %884 = vmatpush.msra.mxu3 %v606_v20  ;;  %v605_v22 = vld [vmem:[#allocation2 + $0x20] sm:$0xff]  ;;  %v614_v61 = vpop.permute.xlu2 %613 }
  0x8c   : > { %416 = vst.msk [vmem:[#allocation2 + $0x10] sm:$0xff] %vm403_vm0, %v414_v21 }
  0x8d   : > { %655 = vmatpush.msra.mxu2 %v605_v22  ;;  %885 = vmatpush.msra.mxu3 %v605_v22 }
  0x8f   : > { %870 = vmatmul.msk.f32.gmra.mxu0 %vm465_vm1, %v438_v25 }
  0x92   : > { %v522_v26 = vld [vmem:[#allocation2 + $0x18] sm:$0xff]  ;;  %v453_v42 = vpop.permute.xlu0 %452  ;;  %v458_v45 = vpop.permute.xlu1 %457 }
  0x93   : > { %572 = vmatpush.msra.mxu1 %v522_v26  ;;  %656 = vmatpush.msra.mxu2 %v522_v26  ;;  %v521_v27 = vld [vmem:[#allocation2 + $0x10] sm:$0xff]  ;;  %v629_v14 = vpop.permute.xlu2 %628 }
  0x94   : > { %886 = vmatpush.msra.mxu3 %v522_v26 }
  0x95   : > { %573 = vmatpush.msra.mxu1 %v521_v27  ;;  %657 = vmatpush.msra.mxu2 %v521_v27 }
  0x96   : > { %887 = vmatpush.msra.mxu3 %v521_v27 }
  0x97   : > { %574 = vmatpush.msra.mxu1 %v440_v4  ;;  %658 = vmatpush.msra.mxu2 %v440_v4 }
  0x98   : > { %888 = vmatpush.msra.mxu3 %v440_v4 }
  0x99   : > { %575 = vmatpush.msra.mxu1 %v1032_v5  ;;  %659 = vmatpush.msra.mxu2 %v1032_v5 }
  0x9a   : > { %889 = vmatpush.msra.mxu3 %v1032_v5  ;;  %871 = vmatmul.msk.f32.vlgmr.msra.gmra.mxu1 %vm547_vm2, %v515_v29  ;;  %v530_v53 = vpop.permute.xlu1 %529  ;;  %v540_v54 = vpop.permute.xlu0 %539 }
  0x9b   : > { %875 = vmatmul.msk.f32.vlgmr.msra.gmra.mxu2 %vm631_vm3, %v597_v30  ;;  %876 = vmatmul.msk.f32.vlgmr.msra.gmra.mxu3 %vm631_vm3, %v598_v31 }
  0xa2   : > { %872 = vmatmul.msk.f32.gmra.mxu1 %vm547_vm2, %v516_v32  ;;  %v545_v59 = vpop.permute.xlu1 %544  ;;  %v619_v60 = vpop.permute.xlu0 %618 }
  0xa3   : > { %877 = vmatmul.msk.f32.gmra.mxu3 %vm631_vm3, %v599_v33 }
  0xaa   : > { %873 = vmatmul.msk.f32.gmra.mxu1 %vm547_vm2, %v517_v34  ;;  %v624_v7 = vpop.permute.xlu1 %623 }
  0xab   : > { %878 = vmatmul.msk.f32.gmra.mxu3 %vm631_vm3, %v600_v35 }
  0xb2   : > { %874 = vmatmul.msk.f32.gmra.mxu1 %vm547_vm2, %v518_v36 }
  0xf4   : > { %v495_v38 = vpop.f32.mrf.mxu0 }
  0xf5   : > { %v496_v39 = vadd.f32 %v495_v38, %v448_v37 }
  0xf7   : > { %v507_v40 = vmax.f32 %v496_v39, 0.0 }
  0xf9   : > { %511 = vst.msk [vmem:[%s385_s22] sm:$0xff] %vm403_vm0, %v507_v40 }
  0xfc   : > { %v498_v41 = vpop.f32.mrf.mxu0 }
  0xfd   : > { %v499_v43 = vadd.f32 %v498_v41, %v453_v42 }
  0xff   : > { %v508_v44 = vmax.f32 %v499_v43, 0.0 }
 0x101   : > { %512 = vst.msk [vmem:[%s385_s22 + $0x8] sm:$0xff] %vm403_vm0, %v508_v44 }
 0x104   : > { %v501_v46 = vpop.f32.mrf.mxu0 }
 0x105   : > { %v502_v47 = vadd.f32 %v501_v46, %v458_v45 }
 0x107   : > { %v509_v48 = vmax.f32 %v502_v47, 0.0 }
 0x109   : > { %513 = vst.msk [vmem:[%s385_s22 + $0x10] sm:$0xff] %vm403_vm0, %v509_v48 }
 0x10c   : > { %v504_v50 = vpop.f32.mrf.mxu0 }
 0x10d   : > { %v505_v51 = vadd.f32 %v504_v50, %v463_v49 }
 0x10f   : > { %v510_v52 = vmax.f32 %v505_v51, 0.0 }
 0x111   : > { %514 = vst.msk [vmem:[%s385_s22 + $0x18] sm:$0xff] %vm403_vm0, %v510_v52 }
 0x117   : > { %v577_v56 = vpop.f32.mrf.mxu1 }
 0x118   : > { %v578_v57 = vadd.f32 %v577_v56, %v530_v53 }
 0x11a   : > { %v589_v58 = vmax.f32 %v578_v57, 0.0 }
 0x11c   : > { %593 = vst.msk [vmem:[%s1134_s24] sm:$0xff] %vm403_vm0, %v589_v58 }
 0x11e   : > { %v661_v62 = vpop.f32.mrf.mxu2  ;;  %v664_v63 = vpop.f32.mrf.mxu3 }
 0x11f   : > { %v662_v0 = vadd.f32 %v661_v62, %v614_v61  ;;  %v665_v1 = vadd.f32 %v664_v63, %v619_v60  ;;  %v580_v2 = vpop.f32.mrf.mxu1 }
 0x120   : > { %v581_v3 = vadd.f32 %v580_v2, %v535_v55 }
 0x121   : > { %v673_v4 = vmax.f32 %v662_v0, 0.0  ;;  %v674_v5 = vmax.f32 %v665_v1, 0.0 }
 0x122   : > { %v590_v6 = vmax.f32 %v581_v3, 0.0 }
 0x123   : > { %677 = vst.msk [vmem:[%s401_s27] sm:$0xff] %vm403_vm0, %v673_v4 }
 0x124   : > { %678 = vst.msk [vmem:[%s401_s27 + $0x8] sm:$0xff] %vm403_vm0, %v674_v5 }
 0x125   : > { %594 = vst.msk [vmem:[%s1134_s24 + $0x8] sm:$0xff] %vm403_vm0, %v590_v6 }
 0x126   : > { %v667_v8 = vpop.f32.mrf.mxu3 }
 0x127   : > { %v668_v9 = vadd.f32 %v667_v8, %v624_v7  ;;  %v583_v10 = vpop.f32.mrf.mxu1 }
 0x128   : > { %v584_v11 = vadd.f32 %v583_v10, %v540_v54 }
 0x129   : > { %v675_v12 = vmax.f32 %v668_v9, 0.0 }
 0x12a   : > { %v591_v13 = vmax.f32 %v584_v11, 0.0 }
 0x12b   : > { %679 = vst.msk [vmem:[%s401_s27 + $0x10] sm:$0xff] %vm403_vm0, %v675_v12 }
 0x12c   : > { %595 = vst.msk [vmem:[%s1134_s24 + $0x10] sm:$0xff] %vm403_vm0, %v591_v13 }
 0x12e   : > { %v670_v15 = vpop.f32.mrf.mxu3 }
 0x12f   : > { %v671_v16 = vadd.f32 %v670_v15, %v629_v14  ;;  %v586_v17 = vpop.f32.mrf.mxu1 }
 0x130   : > { %v587_v18 = vadd.f32 %v586_v17, %v545_v59 }
 0x131   : > { %v676_v19 = vmax.f32 %v671_v16, 0.0 }
 0x132   : > { %v592_v20 = vmax.f32 %v587_v18, 0.0 }
 0x133   : > { %680 = vst.msk [vmem:[%s401_s27 + $0x18] sm:$0xff] %vm403_vm0, %v676_v19 }
 0x134   : > { %596 = vst.msk [vmem:[%s1134_s24 + $0x18] sm:$0xff] %vm403_vm0, %v592_v20 }
 0x135 PF: > { %s20_s11 = sadd.s32 1, %s945_s11   ;;  %s1171_s30 = smov %s941_s10 }
 0x136   : > { %p17_p5 = scmp.ge.s32.totalorder %s20_s11, 4   ;;  %s1172_s10 = smov %s1174_s12 }
 0x138   :  { %19 = sbr.rel (!%p17_p5) target bundleno = 2 (0x2), region = 102 }

</bundles_post_ra>
